<compile_context>
chip_gen: v5e
topology: v5e:2x2
jax: 0.10.0
libtpu: 0.0.40
codegen_flags: <defaults>
</compile_context>

<pallas_src>
import functools

import jax
import jax.numpy as jnp
import numpy as np
from jax.experimental import pallas as pl
from jax.experimental.pallas import tpu as pltpu


def _disc_mlp_kernel(x_ref, w1_ref, b1_ref, w2_ref, b2_ref, w3_ref, b3_ref,
                     o_ref):
    """Fused 3-layer MLP: (Linear + LeakyReLU(0.2)) x2 -> Linear(., 1)."""
    x = x_ref[...]

    # Layer 1: Linear(pacdim, d1) + LeakyReLU(0.2)   [Dropout == identity]
    h = jnp.dot(x, w1_ref[...], preferred_element_type=jnp.float32)
    h = h + b1_ref[...]
    h = jnp.where(h > 0, h, 0.2 * h)

    # Layer 2: Linear(d1, d2) + LeakyReLU(0.2)       [Dropout == identity]
    h = jnp.dot(h, w2_ref[...], preferred_element_type=jnp.float32)
    h = h + b2_ref[...]
    h = jnp.where(h > 0, h, 0.2 * h)

    # Final layer: Linear(d2, 1).  An N=1 matmul wastes the MXU column width,
    # so do a VPU multiply + lane reduction and store a lane-dense
    # (1, row_tile) slab.
    o = jnp.sum(h * w3_ref[...], axis=-1) + b3_ref[0, 0]     # (row_tile,)
    o_ref[...] = o[None, :]                                   # (1, row_tile)


def _round_up(x, m):
    return (x + m - 1) // m * m


def _pick_row_tile(M, pacdim, d1, d2, vmem_budget_bytes=12 * 1024 * 1024):
    """Pick the largest row tile that (a) covers M in one step when small and
    (b) stays under a conservative VMEM budget otherwise."""
    m8 = _round_up(max(M, 1), 8)
    if m8 <= 512:
        # Whole packed batch in a single grid step.
        return m8
    for rt in (512, 256, 128):
        est = 4 * (
            2 * rt * pacdim                                   # x tiles (2x buf)
            + 2 * rt                                          # output slab
            + 2 * (pacdim * d1 + d1 + d1 * d2 + d2 + d2 + 1)  # weights/biases
            + rt * d1 + rt * d2                               # activations
        )
        if est <= vmem_budget_bytes:
            return rt
    return 128


def discriminator_forward(input_, params, *, pac):
    """Apply the Discriminator to `input_` using a Pallas TPU kernel.

    input_: (B, input_dim) float32, B % pac == 0.
    params: dict with w1 (pacdim,d1), b1 (1,d1), w2 (d1,d2), b2 (1,d2),
            w3 (d2,1), b3 (1,1).
    Returns (B // pac, 1) float32.
    """
    B, input_dim = input_.shape
    assert B % pac == 0, "batch must be divisible by pac"
    pacdim = pac * input_dim

    # Packing (the .view(-1, pacdim) in PyTorch) stays in plain JAX glue.
    x = input_.reshape(B // pac, pacdim)
    M = x.shape[0]

    w1, b1, w2, b2, w3, b3 = (params[k] for k in
                              ("w1", "b1", "w2", "b2", "w3", "b3"))
    d1 = w1.shape[1]
    d2 = w2.shape[1]
    w3_row = w3.reshape(1, d2)   # row vector for the VPU/XLU final layer

    row_tile = _pick_row_tile(M, pacdim, d1, d2)
    M_pad = _round_up(M, row_tile)
    if M_pad != M:
        x = jnp.pad(x, ((0, M_pad - M), (0, 0)))
    grid = (M_pad // row_tile,)

    out = pl.pallas_call(
        _disc_mlp_kernel,
        out_shape=jax.ShapeDtypeStruct((1, M_pad), jnp.float32),
        grid=grid,
        in_specs=[
            # Rows tiled over the grid; weights/biases replicated per tile.
            pl.BlockSpec((row_tile, pacdim), lambda i: (i, 0)),
            pl.BlockSpec((pacdim, d1), lambda i: (0, 0)),
            pl.BlockSpec((1, d1), lambda i: (0, 0)),
            pl.BlockSpec((d1, d2), lambda i: (0, 0)),
            pl.BlockSpec((1, d2), lambda i: (0, 0)),
            pl.BlockSpec((1, d2), lambda i: (0, 0)),
            pl.BlockSpec((1, 1), lambda i: (0, 0)),
        ],
        # Lane-dense output: one (1, row_tile) slab per grid step.
        out_specs=pl.BlockSpec((1, row_tile), lambda i: (0, i)),
        compiler_params=pltpu.CompilerParams(
            dimension_semantics=("parallel",)),
    )(x, w1, b1, w2, b2, w3_row, b3)

    # Drop padding rows and restore the (M, 1) column layout.
    return out[0, :M, None]


def init_discriminator_params(key, input_dim, discriminator_dim, pac):
    """Deterministic init matching torch.nn.Linear shapes (weights stored
    transposed as (in, out))."""
    assert len(discriminator_dim) == 2, "demo uses two hidden layers"
    pacdim = input_dim * pac
    dims = [pacdim, discriminator_dim[0], discriminator_dim[1], 1]
    params = {}
    names = [("w1", "b1"), ("w2", "b2"), ("w3", "b3")]
    for (wn, bn), fan_in, fan_out in zip(names, dims[:-1], dims[1:]):
        key, kw, kb = jax.random.split(key, 3)
        bound = 1.0 / np.sqrt(fan_in)
        params[wn] = jax.random.uniform(
            kw, (fan_in, fan_out), jnp.float32, -bound, bound)
        params[bn] = jax.random.uniform(
            kb, (1, fan_out), jnp.float32, -bound, bound)
    return params


def _reference_forward(input_, params, pac):
    """Pure-JAX reference (eval-mode forward) for correctness checking."""
    B, input_dim = input_.shape
    x = input_.reshape(B // pac, pac * input_dim)
    h = x @ params["w1"] + params["b1"]
    h = jnp.where(h > 0, h, 0.2 * h)
    h = h @ params["w2"] + params["b2"]
    h = jnp.where(h > 0, h, 0.2 * h)
    return h @ params["w3"] + params["b3"]


if __name__ == "__main__":
    input_dim = 32
    pac = 4
    discriminator_dim = (128, 128)

    key = jax.random.PRNGKey(0)
    key, k_params = jax.random.split(key)
    params = init_discriminator_params(k_params, input_dim,
                                       discriminator_dim, pac)

    fwd = jax.jit(functools.partial(discriminator_forward, pac=pac))

    # Case 1: small batch -> single grid step (row_tile == M).
    #   batch = 32  ->  packed rows M = 8
    key, k1 = jax.random.split(key)
    inp_small = jax.random.normal(k1, (32, input_dim), jnp.float32)
    out_small = jax.block_until_ready(fwd(inp_small, params))
    ref_small = _reference_forward(inp_small, params, pac)
    assert out_small.shape == (32 // pac, 1)
    np.testing.assert_allclose(np.asarray(out_small), np.asarray(ref_small),
                               rtol=1e-5, atol=1e-5)

    # Case 2: larger batch -> multi-step grid + tail padding.
    #   batch = 2400 -> M = 600 -> row_tile 512, padded to 1024, grid (2,)
    key, k2 = jax.random.split(key)
    inp_large = jax.random.normal(k2, (2400, input_dim), jnp.float32)
    out_large = jax.block_until_ready(
        jax.jit(functools.partial(discriminator_forward, pac=pac))(
            inp_large, params))
    ref_large = _reference_forward(inp_large, params, pac)
    assert out_large.shape == (2400 // pac, 1)
    np.testing.assert_allclose(np.asarray(out_large), np.asarray(ref_large),
                               rtol=1e-5, atol=1e-5)

    print("KERNEL_OK")
</pallas_src>

<mosaic_0001>
module attributes {stable_mosaic.version = 11 : i64} {
  func.func @_disc_mlp_kernel(%arg0: i32, %arg1: memref<8x128xf32, #tpu.memory_space<vmem>>, %arg2: memref<128x128xf32, #tpu.memory_space<vmem>>, %arg3: memref<1x128xf32, #tpu.memory_space<vmem>>, %arg4: memref<128x128xf32, #tpu.memory_space<vmem>>, %arg5: memref<1x128xf32, #tpu.memory_space<vmem>>, %arg6: memref<1x128xf32, #tpu.memory_space<vmem>>, %arg7: memref<1x1xf32, #tpu.memory_space<vmem>>, %arg8: memref<1x8xf32, #tpu.memory_space<vmem>>) attributes {dimension_semantics = [#tpu.dimension_semantics<parallel>], iteration_bounds = array<i64: 1>, scalar_prefetch = 0 : i64, scratch_operands = 0 : i64, tpu.core_type = #tpu.core_type<tc>, window_params = [{transform_indices = @transform_0, window_bounds = array<i64: 8, 128>}, {pipeline_mode = #tpu.pipeline_mode<synchronous>, transform_indices = @transform_1, window_bounds = array<i64: 128, 128>}, {pipeline_mode = #tpu.pipeline_mode<synchronous>, transform_indices = @transform_2, window_bounds = array<i64: 1, 128>}, {pipeline_mode = #tpu.pipeline_mode<synchronous>, transform_indices = @transform_3, window_bounds = array<i64: 128, 128>}, {pipeline_mode = #tpu.pipeline_mode<synchronous>, transform_indices = @transform_4, window_bounds = array<i64: 1, 128>}, {pipeline_mode = #tpu.pipeline_mode<synchronous>, transform_indices = @transform_5, window_bounds = array<i64: 1, 128>}, {pipeline_mode = #tpu.pipeline_mode<synchronous>, transform_indices = @transform_6, window_bounds = array<i64: 1, 1>}, {transform_indices = @transform_7, window_bounds = array<i64: 1, 8>}]} {
    %c0 = arith.constant 0 : index
    %c0_0 = arith.constant 0 : index
    %0 = vector.load %arg1[%c0, %c0_0] : memref<8x128xf32, #tpu.memory_space<vmem>>, vector<8x128xf32>
    %c0_1 = arith.constant 0 : index
    %c0_2 = arith.constant 0 : index
    %1 = vector.load %arg2[%c0_1, %c0_2] : memref<128x128xf32, #tpu.memory_space<vmem>>, vector<128x128xf32>
    %cst = arith.constant dense<0.000000e+00> : vector<8x128xf32>
    %2 = tpu.matmul %0, %1, %cst {dimension_numbers = #tpu.dot_dimension_numbers<[1], [0], [0], [1], [0, 0, 1, 1], [], []>} : vector<8x128xf32>, vector<128x128xf32>, vector<8x128xf32> -> vector<8x128xf32>
    %c0_3 = arith.constant 0 : index
    %c0_4 = arith.constant 0 : index
    %3 = vector.load %arg3[%c0_3, %c0_4] : memref<1x128xf32, #tpu.memory_space<vmem>>, vector<1x128xf32>
    %4 = vector.broadcast %3 : vector<1x128xf32> to vector<8x128xf32>
    %5 = arith.addf %2, %4 : vector<8x128xf32>
    %cst_5 = arith.constant 0.000000e+00 : f32
    %6 = vector.broadcast %cst_5 : f32 to vector<8x128xf32>
    %7 = arith.cmpf ogt, %5, %6 : vector<8x128xf32>
    %cst_6 = arith.constant 2.000000e-01 : f32
    %8 = vector.broadcast %cst_6 : f32 to vector<8x128xf32>
    %9 = arith.mulf %8, %5 : vector<8x128xf32>
    %10 = arith.select %7, %5, %9 : vector<8x128xi1>, vector<8x128xf32>
    %c0_7 = arith.constant 0 : index
    %c0_8 = arith.constant 0 : index
    %11 = vector.load %arg4[%c0_7, %c0_8] : memref<128x128xf32, #tpu.memory_space<vmem>>, vector<128x128xf32>
    %cst_9 = arith.constant dense<0.000000e+00> : vector<8x128xf32>
    %12 = tpu.matmul %10, %11, %cst_9 {dimension_numbers = #tpu.dot_dimension_numbers<[1], [0], [0], [1], [0, 0, 1, 1], [], []>} : vector<8x128xf32>, vector<128x128xf32>, vector<8x128xf32> -> vector<8x128xf32>
    %c0_10 = arith.constant 0 : index
    %c0_11 = arith.constant 0 : index
    %13 = vector.load %arg5[%c0_10, %c0_11] : memref<1x128xf32, #tpu.memory_space<vmem>>, vector<1x128xf32>
    %14 = vector.broadcast %13 : vector<1x128xf32> to vector<8x128xf32>
    %15 = arith.addf %12, %14 : vector<8x128xf32>
    %cst_12 = arith.constant 0.000000e+00 : f32
    %16 = vector.broadcast %cst_12 : f32 to vector<8x128xf32>
    %17 = arith.cmpf ogt, %15, %16 : vector<8x128xf32>
    %cst_13 = arith.constant 2.000000e-01 : f32
    %18 = vector.broadcast %cst_13 : f32 to vector<8x128xf32>
    %19 = arith.mulf %18, %15 : vector<8x128xf32>
    %20 = arith.select %17, %15, %19 : vector<8x128xi1>, vector<8x128xf32>
    %c0_14 = arith.constant 0 : index
    %c0_15 = arith.constant 0 : index
    %21 = vector.load %arg6[%c0_14, %c0_15] : memref<1x128xf32, #tpu.memory_space<vmem>>, vector<1x128xf32>
    %22 = vector.broadcast %21 : vector<1x128xf32> to vector<8x128xf32>
    %23 = arith.mulf %20, %22 : vector<8x128xf32>
    %cst_16 = arith.constant dense<0.000000e+00> : vector<8xf32>
    %24 = vector.multi_reduction <add>, %23, %cst_16 [1] : vector<8x128xf32> to vector<8xf32>
    %c0_17 = arith.constant 0 : index
    %c0_18 = arith.constant 0 : index
    %25 = vector.load %arg7[%c0_17, %c0_18] : memref<1x1xf32, #tpu.memory_space<vmem>>, vector<1x1xf32>
    %26 = vector.extract %25[0, 0] : f32 from vector<1x1xf32>
    %27 = vector.broadcast %26 : f32 to vector<8xf32>
    %28 = arith.addf %24, %27 : vector<8xf32>
    %29 = vector.shape_cast %28 : vector<8xf32> to vector<1x8xf32>
    %c0_19 = arith.constant 0 : index
    %c0_20 = arith.constant 0 : index
    %30 = vector.load %arg8[%c0_19, %c0_20] : memref<1x8xf32, #tpu.memory_space<vmem>>, vector<1x8xf32>
    tpu.vector_store %arg8[%c0_19, %c0_20], %29 {strides = array<i32>} : memref<1x8xf32, #tpu.memory_space<vmem>>, vector<1x8xf32>,
    return
  }
  func.func @transform_0(%arg0: i32) -> (i32, i32) {
    %c0_i32 = arith.constant 0 : i32
    %c0_i32_0 = arith.constant 0 : i32
    return %arg0, %c0_i32 : i32, i32
  }
  func.func @transform_1(%arg0: i32) -> (i32, i32) {
    %c0_i32 = arith.constant 0 : i32
    %c0_i32_0 = arith.constant 0 : i32
    %c0_i32_1 = arith.constant 0 : i32
    return %c0_i32, %c0_i32_0 : i32, i32
  }
  func.func @transform_2(%arg0: i32) -> (i32, i32) {
    %c0_i32 = arith.constant 0 : i32
    %c0_i32_0 = arith.constant 0 : i32
    %c0_i32_1 = arith.constant 0 : i32
    return %c0_i32, %c0_i32_0 : i32, i32
  }
  func.func @transform_3(%arg0: i32) -> (i32, i32) {
    %c0_i32 = arith.constant 0 : i32
    %c0_i32_0 = arith.constant 0 : i32
    %c0_i32_1 = arith.constant 0 : i32
    return %c0_i32, %c0_i32_0 : i32, i32
  }
  func.func @transform_4(%arg0: i32) -> (i32, i32) {
    %c0_i32 = arith.constant 0 : i32
    %c0_i32_0 = arith.constant 0 : i32
    %c0_i32_1 = arith.constant 0 : i32
    return %c0_i32, %c0_i32_0 : i32, i32
  }
  func.func @transform_5(%arg0: i32) -> (i32, i32) {
    %c0_i32 = arith.constant 0 : i32
    %c0_i32_0 = arith.constant 0 : i32
    %c0_i32_1 = arith.constant 0 : i32
    return %c0_i32, %c0_i32_0 : i32, i32
  }
  func.func @transform_6(%arg0: i32) -> (i32, i32) {
    %c0_i32 = arith.constant 0 : i32
    %c0_i32_0 = arith.constant 0 : i32
    %c0_i32_1 = arith.constant 0 : i32
    return %c0_i32, %c0_i32_0 : i32, i32
  }
  func.func @transform_7(%arg0: i32) -> (i32, i32) {
    %c0_i32 = arith.constant 0 : i32
    %c0_i32_0 = arith.constant 0 : i32
    return %c0_i32, %arg0 : i32, i32
  }
}

</mosaic_0001>

<bundles_post_ra>
// kernel: discriminator_forward.1
= control target key start
LH: loop header
LB: loop body
LE: loop exit
PB: predicated region body
PF: predicated region fallthrough
CT: control target
= control target key end

     0   :  { %s341_s0 = inlined_call_operand.vmem [shape: f32[8,128], index: 0, kind: input, shape index: {}]   ;;  %s342_s1 = inlined_call_operand.hbm [shape: f32[128,128], index: 1, kind: input, shape index: {}]   ;;  %s343_s2 = inlined_call_operand.vmem [shape: f32[1,128], index: 2, kind: input, shape index: {}]   ;;  %s344_s3 = inlined_call_operand.hbm [shape: f32[128,128], index: 3, kind: input, shape index: {}]   ;;  %s345_s4 = inlined_call_operand.vmem [shape: f32[1,128], index: 4, kind: input, shape index: {}]   ;;  %s346_s5 = inlined_call_operand.vmem [shape: f32[1,128], index: 5, kind: input, shape index: {}]   ;;  %s347_s6 = inlined_call_operand.<no memory space> [shape: f32[1,1], index: 6, kind: input, shape index: {}]   ;;  %s348_s7 = inlined_call_operand.hbm [shape: f32[1,8], index: 7, kind: output, shape index: {}]  }
   0x1   :  { %v12_v0 = vstv %s347_s6 }
   0x2   :  { %13 = vst [vmem:[#allocation2] sm:$0x1] %v12_v0 }
   0x3   :  { %14 = vsyncpa [#allocation4], 0 }
   0x4   :  { %15 = vsyncpa [#allocation7], 0 }
   0x5   :  { %16 = vsyncpa [#allocation5], 0  ;;  %s23_s28 = sshll.u32 %s342_s1, 4  ;;  %s272_s29 = smov [#allocation3]   ;;  %s24_s28 = int_to_ptr.hbm [resolvable:$true] %s23_s28 }
   0x6   :  { %s25_s30 = sshll.u32 %s272_s29, 4  ;;  %s38_s10 = sshll.u32 %s344_s3, 4  ;;  %s26_s30 = int_to_ptr.vmem [resolvable:$true] %s25_s30  ;;  %s39_s10 = int_to_ptr.hbm [resolvable:$true] %s38_s10 }
   0x7   :  { %s273_s11 = smov 128   ;;  %s274_s12 = smov 8  }
   0x8   :  { %31 = dma.hbm_to_vmem [thread:$0]  %s24_s28, 2048, %s26_s30, [#allocation4], %s273_s11, %s273_s11, %s274_s12  }
   0x9   :  { %s275_s6 = smov [#allocation6]  }
   0xa   :  { %s40_s13 = sshll.u32 %s275_s6, 4  ;;  %s41_s13 = int_to_ptr.vmem [resolvable:$true] %s40_s13 }
   0xb   :  { %46 = dma.hbm_to_vmem [thread:$0]  %s39_s10, 2048, %s41_s13, [#allocation7], %s273_s11, %s273_s11, %s274_s12  }
   0xc   :  { %266 = dma.done.wait [#allocation4], 2048  }
   0xd   :  { %267 = vsyncadd [#allocation4], 4294965248 }
   0xe   :  { %268 = dma.done.wait [#allocation7], 2048  }
   0xf   :  { %269 = vsyncadd [#allocation7], 4294965248  ;;  %v77_v1 = vld [vmem:[#allocation3 + $0x78] sm:$0xff]  ;;  %v76_v2 = vld [vmem:[#allocation3 + $0x70] sm:$0xff]  ;;  %v160_v47 = vlaneseq  ;;  %s276_s19 = smov [#allocation8]   ;;  %s173_s22 = sshll.u32 %s348_s7, 4  ;;  %s174_s22 = int_to_ptr.hbm [resolvable:$true] %s173_s22 }
  0x10   :  { %82 = vmatpush.msra.mxu0 %v77_v1  ;;  %v75_v3 = vld [vmem:[#allocation3 + $0x68] sm:$0xff]  ;;  %v74_v4 = vld [vmem:[#allocation3 + $0x60] sm:$0xff]  ;;  %v120_v5 = vld [vmem:[#allocation6 + $0x78] sm:$0xff]  ;;  %s171_s20 = sshll.u32 %s276_s19, 4  ;;  %vm164_vm2 = vcmask 57344   ;;  %s172_s20 = int_to_ptr.vmem [resolvable:$true] %s171_s20 }
  0x11   :  { %v73_v6 = vld [vmem:[#allocation3 + $0x58] sm:$0xff]  ;;  %125 = vmatpush.msra.mxu1 %v120_v5  ;;  %v119_v7 = vld [vmem:[#allocation6 + $0x70] sm:$0xff]  ;;  %v118_v8 = vld [vmem:[#allocation6 + $0x68] sm:$0xff]  ;;  %v161_v49 = vand.u32 127, %v160_v47 }
  0x12   :  { %83 = vmatpush.msra.mxu0 %v76_v2  ;;  %v72_v9 = vld [vmem:[#allocation3 + $0x50] sm:$0xff]  ;;  %v117_v10 = vld [vmem:[#allocation6 + $0x60] sm:$0xff]  ;;  %v71_v11 = vld [vmem:[#allocation3 + $0x48] sm:$0xff] }
  0x13   :  { %126 = vmatpush.msra.mxu1 %v119_v7  ;;  %v116_v12 = vld [vmem:[#allocation6 + $0x58] sm:$0xff]  ;;  %v70_v13 = vld [vmem:[#allocation3 + $0x40] sm:$0xff]  ;;  %v115_v14 = vld [vmem:[#allocation6 + $0x50] sm:$0xff] }
  0x14   :  { %84 = vmatpush.msra.mxu0 %v75_v3  ;;  %v69_v15 = vld [vmem:[#allocation3 + $0x38] sm:$0xff]  ;;  %v114_v16 = vld [vmem:[#allocation6 + $0x48] sm:$0xff]  ;;  %v68_v17 = vld [vmem:[#allocation3 + $0x30] sm:$0xff] }
  0x15   :  { %127 = vmatpush.msra.mxu1 %v118_v8  ;;  %v113_v18 = vld [vmem:[#allocation6 + $0x40] sm:$0xff]  ;;  %v67_v19 = vld [vmem:[#allocation3 + $0x28] sm:$0xff]  ;;  %v112_v20 = vld [vmem:[#allocation6 + $0x38] sm:$0xff] }
  0x16   :  { %85 = vmatpush.msra.mxu0 %v74_v4  ;;  %v66_v21 = vld [vmem:[#allocation3 + $0x20] sm:$0xff]  ;;  %v111_v22 = vld [vmem:[#allocation6 + $0x30] sm:$0xff]  ;;  %v65_v23 = vld [vmem:[#allocation3 + $0x18] sm:$0xff] }
  0x17   :  { %128 = vmatpush.msra.mxu1 %v117_v10  ;;  %v110_v24 = vld [vmem:[#allocation6 + $0x28] sm:$0xff]  ;;  %v64_v25 = vld [vmem:[#allocation3 + $0x10] sm:$0xff]  ;;  %v109_v26 = vld [vmem:[#allocation6 + $0x20] sm:$0xff] }
  0x18   :  { %86 = vmatpush.msra.mxu0 %v73_v6  ;;  %v63_v27 = vld [vmem:[#allocation3 + $0x8] sm:$0xff]  ;;  %v108_v28 = vld [vmem:[#allocation6 + $0x18] sm:$0xff]  ;;  %v62_v29 = vld [vmem:[#allocation3] sm:$0xff] }
  0x19   :  { %129 = vmatpush.msra.mxu1 %v116_v12  ;;  %v61_v30 = vld [vmem:[%s341_s0] sm:$0xff]  ;;  %v107_v31 = vld [vmem:[#allocation6 + $0x10] sm:$0xff]  ;;  %v106_v32 = vld [vmem:[#allocation6 + $0x8] sm:$0xff] }
  0x1a   :  { %87 = vmatpush.msra.mxu0 %v72_v9  ;;  %v105_v33 = vld [vmem:[#allocation6] sm:$0xff]  ;;  %v191_v34 = vld [vmem:[%s343_s2] ss:$0 sm:$0xff] }
  0x1b   :  { %130 = vmatpush.msra.mxu1 %v115_v14  ;;  %v155_v39 = vld [vmem:[#allocation2] sm:$0x1] }
  0x1c   :  { %88 = vmatpush.msra.mxu0 %v71_v11  ;;  %184 = vpush %v155_v39  ;;  %v192_v40 = vld [vmem:[%s345_s4] ss:$0 sm:$0xff] }
  0x1d   :  { %131 = vmatpush.msra.mxu1 %v114_v16  ;;  %v193_v43 = vld [vmem:[%s346_s5] ss:$0 sm:$0xff] }
  0x1e   :  { %89 = vmatpush.msra.mxu0 %v70_v13 }
  0x1f   :  { %132 = vmatpush.msra.mxu1 %v113_v18 }
  0x20   :  { %90 = vmatpush.msra.mxu0 %v69_v15 }
  0x21   :  { %133 = vmatpush.msra.mxu1 %v112_v20 }
  0x22   :  { %91 = vmatpush.msra.mxu0 %v68_v17 }
  0x23   :  { %134 = vmatpush.msra.mxu1 %v111_v22 }
  0x24   :  { %92 = vmatpush.msra.mxu0 %v67_v19 }
  0x25   :  { %135 = vmatpush.msra.mxu1 %v110_v24 }
  0x26   :  { %93 = vmatpush.msra.mxu0 %v66_v21 }
  0x27   :  { %136 = vmatpush.msra.mxu1 %v109_v26 }
  0x28   :  { %94 = vmatpush.msra.mxu0 %v65_v23 }
  0x29   :  { %137 = vmatpush.msra.mxu1 %v108_v28 }
  0x2a   :  { %95 = vmatpush.msra.mxu0 %v64_v25 }
  0x2b   :  { %138 = vmatpush.msra.mxu1 %v107_v31 }
  0x2c   :  { %96 = vmatpush.msra.mxu0 %v63_v27 }
  0x2d   :  { %139 = vmatpush.msra.mxu1 %v106_v32 }
  0x2e   :  { %97 = vmatpush.msra.mxu0 %v62_v29 }
  0x2f   :  { %98 = vmatmul.f32.vlgmr.msra.gmra.mxu0 %v61_v30  ;;  %140 = vmatpush.msra.mxu1 %v105_v33 }
  0x4d   :  { %s185_s2 = spop %184 }
  0x4e   :  { %v157_v48 = vstv %s185_s2 }
  0xac   :  { %v99_v35 = vpop.f32.mrf.mxu0 }
  0xad   :  { %v100_v36 = vadd.f32 %v191_v34, %v99_v35 }
  0xaf   :  { %vm102_vm0 = vcmp.gt.f32.partialorder %v100_v36, 0.0  ;;  %v103_v37 = vmul.f32 0.2, %v100_v36 }
  0xb1   :  { %v104_v38 = vsel %vm102_vm0, %v100_v36, %v103_v37 }
  0xb2   :  { %141 = vmatmul.f32.vlgmr.msra.gmra.mxu1 %v104_v38 }
 0x12f   :  { %v142_v41 = vpop.f32.mrf.mxu1 }
 0x130   :  { %v143_v42 = vadd.f32 %v192_v40, %v142_v41 }
 0x132   :  { %v146_v44 = vmul.f32 0.2, %v143_v42  ;;  %vm145_vm1 = vcmp.gt.f32.partialorder %v143_v42, 0.0 }
 0x134   :  { %v147_v45 = vsel %vm145_vm1, %v143_v42, %v146_v44 }
 0x135   :  { %v152_v46 = vmul.f32 %v193_v43, %v147_v45 }
 0x137   :  { %153 = vadd.xlane.f32.xlu0 %v152_v46 }
 0x1aa   :  { %v154_v50 = vpop.xlane.xlu0 %153 }
 0x1ab   :  { %v158_v51 = vadd.f32 %v157_v48, %v154_v50 }
 0x1ad   :  { %v162_v52 = vperm.slane %v158_v51, %v161_v49 }
 0x1af   :  { %165 = vst.msk [vmem:[#allocation8] sm:$0x1] %vm164_vm2, %v162_v52 }
 0x1b0   :  { %176 = dma.vmem_to_hbm [thread:$0]  %s172_s20, 16, %s174_s22, [#allocation5]  }
 0x1b1   :  { %270 = dma.done.wait [#allocation5], 16  }
 0x1b2   :  { %271 = vsyncadd [#allocation5], 4294967280 }
 0x1b3   :  { %181 = vsyncpa [#allocation4], 1 }
 0x1b4   :  { %182 = vsyncpa [#allocation7], 1 }
 0x1b5   :  { %183 = vsyncpa [#allocation5], 1 }

</bundles_post_ra>
